<compile_context>
chip_gen: v6e
topology: v6e:2x2x1
jax: 0.10.0
libtpu: 0.0.40
codegen_flags: <defaults>
</compile_context>

<pallas_src>
import functools

import jax
import jax.numpy as jnp
from jax.experimental import pallas as pl
from jax.experimental.pallas import tpu as pltpu


_LANE = 128
_MIB = 1024 * 1024


# --------------------------------------------------------------------------
# Hardware-aware budgets
# --------------------------------------------------------------------------

def _round_up(x, m):
    return ((x + m - 1) // m) * m


def _cdiv(a, b):
    return -(-a // b)


def _vmem_capacity_bytes():
    try:
        return int(pltpu.get_tpu_info().vmem_capacity_bytes)
    except Exception:
        return 64 * _MIB                      # conservative: v7x per-TC VMEM


def _budgets():
    cap = _vmem_capacity_bytes()
    if cap <= 64 * _MIB:
        # v7x-like: 64 MiB VMEM per TensorCore, 2 TensorCores per chip.
        return dict(vmem_limit=48 * _MIB, fused=40 * _MIB,
                    tile=16 * _MIB, multi_tc=True)
    # v5e / v6e: 128 MiB VMEM, single TensorCore.
    return dict(vmem_limit=104 * _MIB, fused=92 * _MIB,
                tile=24 * _MIB, multi_tc=False)


# --------------------------------------------------------------------------
# Kernels
# --------------------------------------------------------------------------

def se_fused_kernel(x_ref, w1_ref, w2_ref, o_ref):
    """Single pass: whole (C, HW) image of one batch element resident in VMEM."""
    x = x_ref[0]                                                    # (C, HW), native dtype
    # Channel sums in f32 (dtype= keeps the accumulate in f32 without an
    # explicit astype of the whole tile).  1/HW is pre-folded into W1.
    pooled = jnp.sum(x, axis=-1, keepdims=True, dtype=jnp.float32)  # (C, 1)
    h = jnp.maximum(
        jnp.dot(w1_ref[...], pooled, preferred_element_type=jnp.float32), 0.0)
    s = jax.nn.sigmoid(
        jnp.dot(w2_ref[...], h, preferred_element_type=jnp.float32))  # (C, 1)
    # Broadcast scale in the input dtype (bf16 stays bf16 on v6e/v7x).
    o_ref[0] = x * s.astype(x.dtype)


def se_pool_kernel(x_ref, sum_ref, *, tile, hw):
    """Pass 1 of the tiled path: per-channel sums across spatial tiles."""
    @pl.when(pl.program_id(1) == 0)
    def _init():
        sum_ref[...] = jnp.zeros_like(sum_ref)

    x = x_ref[0]                                                    # (C, T), native dtype
    if hw % tile != 0:
        # cdiv grid: the last tile overhangs the array and its trailing lanes
        # hold stale DMA-buffer data -> mask them out of the reduction.  The
        # predicate depends on program_id so it cannot be constant-folded.
        start = pl.program_id(1) * tile
        lane = jax.lax.broadcasted_iota(jnp.int32, x.shape, 1) + start
        x = jnp.where(lane < hw, x, jnp.zeros_like(x))
    sum_ref[...] += jnp.sum(x, axis=-1, keepdims=True, dtype=jnp.float32)[None]


def se_scale_kernel(x_ref, s_ref, o_ref):
    """Pass 2 of the tiled path: broadcast multiply by the channel scale.

    Out-of-bounds lanes of the partial last tile are dropped on writeback,
    so no masking is needed here."""
    x = x_ref[0]                                                    # (C, T), native dtype
    o_ref[0] = x * s_ref[0].astype(x.dtype)                         # (C, 1) broadcast


# --------------------------------------------------------------------------
# Tile selection
# --------------------------------------------------------------------------

def _pick_spatial_tile(hw, c, itemsize, *, n_bufs, budget, f32_reduce_temp=False):
    """Largest lane-dense spatial tile whose buffers fit `budget`.

    Uses a cdiv grid (no divisibility requirement), so it never falls off the
    T=128 cliff for non-aligned HW; when one tile covers everything it returns
    the exact HW (block == full dim, always legal)."""
    hw_lanes = _round_up(hw, _LANE)

    def tile_bytes(t):
        b = n_bufs * c * t * itemsize
        if f32_reduce_temp and itemsize < 4:
            b += c * t * 4            # possible f32 reduce intermediate (bf16 inputs)
        return b

    fitting = [t for t in (2048, 1024, 512, 256, 128)
               if t <= hw_lanes and tile_bytes(t) <= budget]
    if not fitting:
        # TODO(synk): for extremely large C even a 128-lane tile exceeds the
        # budget; channel tiling would be required there.
        t = 128
    else:
        big = [t for t in fitting if t >= 512] or fitting
        # Minimise total streamed lanes (overhang waste); prefer bigger tiles on ties.
        t = min(big, key=lambda u: (_cdiv(hw_lanes, u) * u, -u))
    if t >= hw:
        return hw                     # single full-width tile
    return t


# --------------------------------------------------------------------------
# Wrapper
# --------------------------------------------------------------------------

def se_block(x, w1, w2, *, force_tiled=False):
    """x: (B, C, H, W) NCHW; w1: (C//r, C); w2: (C, C//r). Returns (B, C, H, W)."""
    B, C, H, W = x.shape
    HW = H * W
    hidden = w1.shape[0]
    assert w1.shape == (hidden, C) and w2.shape == (C, hidden)

    cfg = _budgets()
    itemsize = jnp.dtype(x.dtype).itemsize
    hw_lanes = _round_up(HW, _LANE)            # VMEM lane-padded width of one image
    bytes_per_image = C * hw_lanes * itemsize

    x_flat = x.reshape(B, C, HW)               # free view; no HBM pad copy

    # Fused path: 2x double-buffered (in + out) image tiles, plus a possible
    # in-kernel f32 reduce intermediate for sub-f32 inputs.
    fused_need = 4 * bytes_per_image
    if itemsize < 4:
        fused_need += C * hw_lanes * 4
    fits_fused = fused_need <= cfg["fused"]

    # On a 2-TensorCore chip (v7x) a grid of (B,) with B == 1 leaves one core
    # idle; prefer the tiled path there when it exposes multiple grid steps.
    starves_megacore = cfg["multi_tc"] and B < 2 and HW > 2048

    use_fused = (not force_tiled) and fits_fused and not starves_megacore

    if use_fused:
        # ---- Path 1: fused single pass, grid over batch only ----
        w1_eff = w1.astype(jnp.float32) / float(HW)      # fold 1/HW into W1
        w2_f32 = w2.astype(jnp.float32)                  # hoist weight cast out of kernel
        out_flat = pl.pallas_call(
            se_fused_kernel,
            out_shape=jax.ShapeDtypeStruct((B, C, HW), x.dtype),
            grid_spec=pltpu.PrefetchScalarGridSpec(
                num_scalar_prefetch=0,
                grid=(B,),
                in_specs=[
                    pl.BlockSpec((1, C, HW), lambda b: (b, 0, 0)),
                    pl.BlockSpec((hidden, C), lambda b: (0, 0)),
                    pl.BlockSpec((C, hidden), lambda b: (0, 0)),
                ],
                out_specs=pl.BlockSpec((1, C, HW), lambda b: (b, 0, 0)),
            ),
            compiler_params=pltpu.CompilerParams(
                dimension_semantics=("parallel",),
                vmem_limit_bytes=cfg["vmem_limit"]),
        )(x_flat, w1_eff, w2_f32)
    else:
        # ---- Path 2: spatially tiled, two passes ----
        # Pool pass has no (C, T) output tile -> only the input is
        # double-buffered, so its tile can be larger than the scale pass's.
        t_pool = _pick_spatial_tile(HW, C, itemsize, n_bufs=2,
                                    budget=cfg["tile"], f32_reduce_temp=True)
        t_scale = _pick_spatial_tile(HW, C, itemsize, n_bufs=4,
                                     budget=cfg["tile"])
        n_pool = _cdiv(HW, t_pool)
        n_scale = _cdiv(HW, t_scale)

        # Pass 1: per-channel sums, accumulated across the spatial grid axis.
        sums = pl.pallas_call(
            functools.partial(se_pool_kernel, tile=t_pool, hw=HW),
            out_shape=jax.ShapeDtypeStruct((B, C, 1), jnp.float32),
            grid_spec=pltpu.PrefetchScalarGridSpec(
                num_scalar_prefetch=0,
                grid=(B, n_pool),
                in_specs=[pl.BlockSpec((1, C, t_pool), lambda b, t: (b, 0, t))],
                out_specs=pl.BlockSpec((1, C, 1), lambda b, t: (b, 0, 0)),
            ),
            compiler_params=pltpu.CompilerParams(
                dimension_semantics=("parallel", "arbitrary"),
                vmem_limit_bytes=cfg["vmem_limit"]),
        )(x_flat)

        # Excitation: one batched tiny MLP between the passes (keeps the GEMV
        # off every grid step's critical path).
        pooled = sums[:, :, 0] * (1.0 / float(HW))                         # (B, C)
        h = jnp.maximum(pooled @ w1.astype(jnp.float32).T, 0.0)            # (B, C//r)
        s = jax.nn.sigmoid(h @ w2.astype(jnp.float32).T)[:, :, None]       # (B, C, 1)

        # Pass 2: broadcast channel scale; both axes independent -> 'parallel'.
        out_flat = pl.pallas_call(
            se_scale_kernel,
            out_shape=jax.ShapeDtypeStruct((B, C, HW), x.dtype),
            grid_spec=pltpu.PrefetchScalarGridSpec(
                num_scalar_prefetch=0,
                grid=(B, n_scale),
                in_specs=[
                    pl.BlockSpec((1, C, t_scale), lambda b, t: (b, 0, t)),
                    pl.BlockSpec((1, C, 1), lambda b, t: (b, 0, 0)),
                ],
                out_specs=pl.BlockSpec((1, C, t_scale), lambda b, t: (b, 0, t)),
            ),
            compiler_params=pltpu.CompilerParams(
                dimension_semantics=("parallel", "parallel"),
                vmem_limit_bytes=cfg["vmem_limit"]),
        )(x_flat, s)

    return out_flat.reshape(B, C, H, W)


def se_block_ref(x, w1, w2):
    """Pure-JAX reference matching the PyTorch module."""
    y = jnp.mean(x, axis=(2, 3))                 # (B, C)
    y = jnp.maximum(y @ w1.T, 0.0)               # (B, C//r)
    y = jax.nn.sigmoid(y @ w2.T)                 # (B, C)
    return x * y[:, :, None, None]


if __name__ == "__main__":
    # Shapes consistent with SEBlock(channel=8, reduction=4).
    B, C, H, W = 2, 8, 16, 16
    reduction = 4
    hidden = C // reduction

    key = jax.random.PRNGKey(0)
    kx, k1, k2 = jax.random.split(key, 3)

    x = jax.random.normal(kx, (B, C, H, W), dtype=jnp.float32)
    # PyTorch nn.Linear weight convention: (out_features, in_features), no bias.
    w1 = jax.random.normal(k1, (hidden, C), dtype=jnp.float32) * 0.5
    w2 = jax.random.normal(k2, (C, hidden), dtype=jnp.float32) * 0.5

    ref = se_block_ref(x, w1, w2)

    # Path 1: fused single pass (small image fits the VMEM budget).
    out_fused = jax.block_until_ready(se_block(x, w1, w2))
    assert out_fused.shape == (B, C, H, W)
    assert jnp.allclose(out_fused, ref, atol=3e-5, rtol=3e-5), "fused path mismatch"

    # Path 2: spatially tiled two-pass (pool -> excitation -> scale).
    out_tiled = jax.block_until_ready(se_block(x, w1, w2, force_tiled=True))
    assert jnp.allclose(out_tiled, ref, atol=3e-5, rtol=3e-5), "tiled path mismatch"

    # Non-128-aligned spatial size (7x7): exercises the pad-free ragged blocks
    # on both paths (no jnp.pad / output slice anywhere).
    x2 = jax.random.normal(jax.random.PRNGKey(1), (B, C, 7, 7), dtype=jnp.float32)
    ref2 = se_block_ref(x2, w1, w2)
    out2f = jax.block_until_ready(se_block(x2, w1, w2))
    assert jnp.allclose(out2f, ref2, atol=3e-5, rtol=3e-5), "ragged fused mismatch"
    out2t = jax.block_until_ready(se_block(x2, w1, w2, force_tiled=True))
    assert jnp.allclose(out2t, ref2, atol=3e-5, rtol=3e-5), "ragged tiled mismatch"

    print("KERNEL_OK")
</pallas_src>

<mosaic_0001>
module attributes {stable_mosaic.version = 11 : i64} {
  func.func @se_fused_kernel(%arg0: i32, %arg1: memref<1x8x256xf32, #tpu.memory_space<vmem>>, %arg2: memref<2x8xf32, #tpu.memory_space<vmem>>, %arg3: memref<8x2xf32, #tpu.memory_space<vmem>>, %arg4: memref<1x8x256xf32, #tpu.memory_space<vmem>>) attributes {dimension_semantics = [#tpu.dimension_semantics<parallel>], iteration_bounds = array<i64: 2>, scalar_prefetch = 0 : i64, scratch_operands = 0 : i64, tpu.core_type = #tpu.core_type<tc>, window_params = [{transform_indices = @transform_0, window_bounds = array<i64: 1, 8, 256>}, {pipeline_mode = #tpu.pipeline_mode<synchronous>, transform_indices = @transform_1, window_bounds = array<i64: 2, 8>}, {pipeline_mode = #tpu.pipeline_mode<synchronous>, transform_indices = @transform_2, window_bounds = array<i64: 8, 2>}, {transform_indices = @transform_3, window_bounds = array<i64: 1, 8, 256>}]} {
    %c0 = arith.constant 0 : index
    %c0_0 = arith.constant 0 : index
    %c0_1 = arith.constant 0 : index
    %0 = vector.load %arg1[%c0, %c0_0, %c0_1] : memref<1x8x256xf32, #tpu.memory_space<vmem>>, vector<1x8x256xf32>
    %1 = vector.shape_cast %0 : vector<1x8x256xf32> to vector<8x256xf32>
    %cst = arith.constant dense<0.000000e+00> : vector<8xf32>
    %2 = vector.multi_reduction <add>, %1, %cst [1] : vector<8x256xf32> to vector<8xf32>
    %3 = vector.shape_cast %2 : vector<8xf32> to vector<8x1xf32>
    %c0_2 = arith.constant 0 : index
    %c0_3 = arith.constant 0 : index
    %4 = vector.load %arg2[%c0_2, %c0_3] : memref<2x8xf32, #tpu.memory_space<vmem>>, vector<2x8xf32>
    %cst_4 = arith.constant dense<0.000000e+00> : vector<2x1xf32>
    %5 = tpu.matmul %4, %3, %cst_4 {dimension_numbers = #tpu.dot_dimension_numbers<[1], [0], [0], [1], [0, 0, 1, 1], [], []>} : vector<2x8xf32>, vector<8x1xf32>, vector<2x1xf32> -> vector<2x1xf32>
    %cst_5 = arith.constant 0.000000e+00 : f32
    %6 = vector.broadcast %cst_5 : f32 to vector<2x1xf32>
    %7 = arith.maximumf %5, %6 : vector<2x1xf32>
    %c0_6 = arith.constant 0 : index
    %c0_7 = arith.constant 0 : index
    %8 = vector.load %arg3[%c0_6, %c0_7] : memref<8x2xf32, #tpu.memory_space<vmem>>, vector<8x2xf32>
    %cst_8 = arith.constant dense<0.000000e+00> : vector<8x1xf32>
    %9 = tpu.matmul %8, %7, %cst_8 {dimension_numbers = #tpu.dot_dimension_numbers<[1], [0], [0], [1], [0, 0, 1, 1], [], []>} : vector<8x2xf32>, vector<2x1xf32>, vector<8x1xf32> -> vector<8x1xf32>
    %10 = arith.negf %9 : vector<8x1xf32>
    %11 = math.exp %10 : vector<8x1xf32>
    %cst_9 = arith.constant 1.000000e+00 : f32
    %12 = vector.broadcast %cst_9 : f32 to vector<8x1xf32>
    %13 = arith.addf %12, %11 : vector<8x1xf32>
    %14 = arith.divf %12, %13 : vector<8x1xf32>
    %15 = vector.broadcast %14 : vector<8x1xf32> to vector<8x256xf32>
    %16 = arith.mulf %1, %15 : vector<8x256xf32>
    %c0_10 = arith.constant 0 : index
    %c0_11 = arith.constant 0 : index
    %c0_12 = arith.constant 0 : index
    %17 = vector.load %arg4[%c0_10, %c0_11, %c0_12] : memref<1x8x256xf32, #tpu.memory_space<vmem>>, vector<1x8x256xf32>
    %18 = vector.shape_cast %17 : vector<1x8x256xf32> to vector<8x256xf32>
    %19 = vector.shape_cast %16 : vector<8x256xf32> to vector<1x8x256xf32>
    tpu.vector_store %arg4[%c0_10, %c0_11, %c0_12], %19 {strides = array<i32>} : memref<1x8x256xf32, #tpu.memory_space<vmem>>, vector<1x8x256xf32>,
    return
  }
  func.func @transform_0(%arg0: i32) -> (i32, i32, i32) {
    %c0_i32 = arith.constant 0 : i32
    %c0_i32_0 = arith.constant 0 : i32
    %c0_i32_1 = arith.constant 0 : i32
    return %arg0, %c0_i32, %c0_i32_0 : i32, i32, i32
  }
  func.func @transform_1(%arg0: i32) -> (i32, i32) {
    %c0_i32 = arith.constant 0 : i32
    %c0_i32_0 = arith.constant 0 : i32
    %c0_i32_1 = arith.constant 0 : i32
    return %c0_i32, %c0_i32_0 : i32, i32
  }
  func.func @transform_2(%arg0: i32) -> (i32, i32) {
    %c0_i32 = arith.constant 0 : i32
    %c0_i32_0 = arith.constant 0 : i32
    %c0_i32_1 = arith.constant 0 : i32
    return %c0_i32, %c0_i32_0 : i32, i32
  }
  func.func @transform_3(%arg0: i32) -> (i32, i32, i32) {
    %c0_i32 = arith.constant 0 : i32
    %c0_i32_0 = arith.constant 0 : i32
    %c0_i32_1 = arith.constant 0 : i32
    return %arg0, %c0_i32, %c0_i32_0 : i32, i32, i32
  }
}

</mosaic_0001>

<bundles_post_ra>
// kernel: tpu_custom_call.1
= control target key start
LH: loop header
LB: loop body
LE: loop exit
PB: predicated region body
PF: predicated region fallthrough
CT: control target
= control target key end

     0   :  { %8 = vsyncpa [#allocation3], 0  ;;  %s811_s0 = inlined_call_operand.hbm [shape: f32[2,8,256], index: 0, kind: input, shape index: {}]   ;;  %s812_s1 = inlined_call_operand.vmem [shape: f32[2,8], index: 1, kind: input, shape index: {}]   ;;  %s813_s2 = inlined_call_operand.vmem [shape: f32[8,2], index: 2, kind: input, shape index: {}]   ;;  %s814_s3 = inlined_call_operand.hbm [shape: f32[2,8,256], index: 3, kind: output, shape index: {}]  }
   0x1   :  { %10 = vsyncpa [#allocation3 + $0x1], 0 }
   0x2   :  { %11 = vsyncpa [#allocation4], 0 }
   0x3   :  { %13 = vsyncpa [#allocation4 + $0x1], 0  ;;  %s654_s12 = smov 0   ;;  %s656_s13 = smov 0  }
   0x4   :  { %s658_s14 = smov 0   ;;  %s660_s15 = smov 0  }
   0x5 LB: > { %s675_s16 = sadd.s32 4294967295, %s627_s15   ;;  %s447_s17 = sadd.s32 4294967294, %s627_s15   ;;  %s627_s15 = sphi %s660_s15, %s831_s15   ;;  %s623_s14 = sphi %s658_s14, %s830_s14   ;;  %s619_s13 = sphi %s656_s13, %s829_s13   ;;  %s615_s12 = sphi %s654_s12, %s828_s12  }
   0x6   : > { %s679_s18 = sadd.s32 1, %s627_s15   ;;  %s26_s19 = sadd.s32 1, %s623_s14 }
   0x7   : > { %s23_s20 = ssub.s32 %s627_s15, %s679_s18  ;;  %p33_p0 = scmp.ne.s32.totalorder %s623_s14, %s619_s13 }
   0x8   : > { %p24_p1 = scmp.eq.s32.totalorder %s23_s20, 0  ;;  %p34_p2 = scmp.eq.s32.totalorder %s627_s15, 0 }
   0x9   : > { %p39_p3 = scmp.ne.s32.totalorder %s619_s13, %s615_s12  ;;  %p40_p4 = scmp.eq.s32.totalorder %s675_s16, 0 }
   0xa   : > { %s691_s21 = scalar_select %p24_p1, %s623_s14, %s26_s19  }
   0xb   : > { %p693_p5 = por %p34_p2, %p33_p0  ;;  %p697_p6 = por %p40_p4, %p39_p3 }
   0xc   : > { %p105_p7 = scmp.eq.s32.totalorder %s675_s16, 1  ;;  %p111_p8 = scmp.eq.s32.totalorder %s447_s17, 1 }
   0xd   : > { %s818_s23 = scalar_select %p697_p6, 1, 0 }
   0xe   : > { %p493_p10 = scmp.lt.s32.totalorder %s627_s15, 2  ;;  %p704_p11 = por %p105_p7, %p33_p0 }
   0xf   : > { %p708_p12 = por %p111_p8, %p39_p3  ;;  %s137_s26 = sand.u32 1, %s623_s14  }
  0x10   : > { %s819_s24 = scalar_select %p704_p11, 1, 0 }
  0x11   : > { %s820_s25 = scalar_select %p708_p12, 1, 0 }
  0x12   : > { %s465_s27 = sshll.u32 %s627_s15, 8  ;;  %s450_s28 = sshll.u32 %s137_s26, 4 }
  0x13   : > { %s717_s4 = scalar_lea.hbm %s811_s0, %s465_s27  ;;  %s141_s5 = scalar_lea.vmem [#allocation2], %s450_s28 }
  0x14   : > { %s149_s6 = sshll.u32 %s141_s5, 4  ;;  %p721_p13 = pnand %p493_p10, %p693_p5  ;;  %s725_s6 = int_to_ptr.vmem [resolvable:$true] %s149_s6 }
  0x15   : > { %s138_s8 = scalar_lea.sflag [#allocation3], %s137_s26  ;;  %s535_s9 = scalar_lea.hbm %s717_s4, 256 }
  0x16   : > { %p536_p2 = scmp.ne.s32.totalorder %s717_s4, %s535_s9  ;;  %p537_p3 = pneg %p721_p13 }
  0x17   : > { %s540_s17 = scalar_lea.hbm %s811_s0, 512  ;;  %p541_p5 = scmp.lt.s32.totalorder %s717_s4, %s811_s0 }
  0x18   : > { %p538_p4 = pnand %p537_p3, %p536_p2  ;;  %p542_p8 = scmp.lt.s32.totalorder %s540_s17, %s535_s9 }
  0x1a   : > { %p539_p7 = pneg %p538_p4  ;;  %p543_p10 = por %p542_p8, %p541_p5 }
  0x1c   : > { %p544_p9 = pnand %p543_p10, %p539_p7 }
  0x1e   : > { %547 = shalt.err (!%p544_p9)
}
  0x1f   : > { %s548_s22 = scalar_lea.vmem %s725_s6, 256  ;;  %s629_s26 = smov [#allocation2]  }
  0x20   : > { %p549_p0 = scmp.ne.s32.totalorder %s725_s6, %s548_s22  ;;  %s553_s27 = sshll.u32 %s629_s26, 4  ;;  %s554_s27 = int_to_ptr.vmem [resolvable:$false] %s553_s27 }
  0x21   : > { %s555_s28 = scalar_lea.vmem %s554_s27, 512  ;;  %p556_p4 = scmp.lt.s32.totalorder %s725_s6, %s554_s27 }
  0x22   : > { %p551_p1 = pnand %p549_p0, %p537_p3  ;;  %p557_p12 = scmp.lt.s32.totalorder %s555_s28, %s548_s22 }
  0x24   : > { %p552_p2 = pneg %p551_p1  ;;  %p558_p11 = por %p557_p12, %p556_p4 }
  0x26   : > { %p559_p6 = pnand %p558_p11, %p552_p2 }
  0x28   : > { %562 = shalt.err (!%p559_p6)
}
  0x29   : > { %488 = dma.hbm_to_vmem [thread:$0]  (!%p721_p13), %s717_s4, 256, %s725_s6, %s138_s8  }
  0x2a   : > { %p822_p9 = scmp.lt.s32.totalorder %s627_s15, 3  ;;  %p823_p7 = scmp.ge.s32.totalorder %s627_s15, 1 }
  0x2c   : > { %p155_p0 = pnand %p823_p7, %p822_p9 }
  0x2d   : > { %s752_s29 = sand.u32 (!%p155_p0), 1, %s619_s13   ;;  %p824_p6 = scmp.ne.s32.totalorder (!%p155_p0), %s818_s23, 0 }
  0x2e   : > { %158 = sbr.rel (%p155_p0) target bundleno = 754 (0x2f2), region = 32  ;;  %s454_s30 = sshll.u32 (!%p155_p0), %s752_s29, 4 }
  0x2f   : > { %s161_s5 = scalar_lea.sflag (!%p155_p0), [#allocation3], %s752_s29  ;;  %s164_s7 = scalar_lea.vmem (!%p155_p0), [#allocation2], %s454_s30 }
  0x33   : > { %606 = dma.done.wait (%p824_p6), %s161_s5, 256  }
  0x34   : > { %608 = vsyncadd (%p824_p6), %s161_s5, 4294967040  ;;  %v630_v0 = vmov 0.0   ;;  %v187_v1 = vld [vmem:[%s164_s7] sm:$0xff]  ;;  %v188_v2 = vld [vmem:[%s164_s7 + $0x8] sm:$0xff]  ;;  %vm631_vm0 = vmmov 0   ;;  %vm193_vm1 = vcmask 64512  }
  0x35   : > { %471 = vmatprep.subr.mxu0 %v630_v0  ;;  %476 = vmatprep.subr.mxu1 %v630_v0  ;;  %v189_v3 = vadd.f32 %v188_v2, %v187_v1  ;;  %v192_v4 = vld [vmem:[%s812_s1] sm:$0x3]  ;;  %vm273_vm2 = vcmask 1041408   ;;  %vm269_vm3 = vcmask 15360   ;;  %v632_v10 = vmov 0   ;;  %s466_s9 = sshll.u32 %s675_s16, 8 }
  0x36   : > { %473 = vmatprep.mubr.msk.f32.mxu0 %vm631_vm0, %v630_v0  ;;  %478 = vmatprep.mubr.msk.f32.mxu1 %vm631_vm0, %v630_v0  ;;  %v268_v8 = vld [vmem:[%s813_s2] sm:$0xff]  ;;  %s186_s10 = scalar_lea.vmem [#allocation5], %s454_s30  ;;  %s774_s20 = scalar_lea.hbm %s814_s3, %s466_s9 }
  0x37   : > { %190 = vadd.xlane.f32.xlu0 %v189_v3  ;;  %s377_s11 = sshll.u32 %s186_s10, 4  ;;  %s363_s22 = scalar_lea.sflag [#allocation4], %s752_s29  ;;  %s378_s11 = int_to_ptr.vmem [resolvable:$true] %s377_s11 }
  0x38   : > { %530 = vset.pattern.permute.xlu0 %v632_v10  ;;  %s563_s26 = scalar_lea.vmem %s378_s11, 256  ;;  %p825_p12 = scmp.ne.s32.totalorder %s819_s24, 0 }
  0x39   : > { %p564_p11 = scmp.ne.s32.totalorder %s378_s11, %s563_s26  ;;  %s633_s16 = smov [#allocation5]  }
  0x3a   : > { %s567_s27 = sshll.u32 %s633_s16, 4  ;;  %s568_s27 = int_to_ptr.vmem [resolvable:$false] %s567_s27 }
  0x3b   : > { %p565_p13 = pnand %p564_p11, %p825_p12  ;;  %s569_s28 = scalar_lea.vmem %s568_s27, 512 }
  0x3c   : > { %p570_p3 = scmp.lt.s32.totalorder %s378_s11, %s568_s27  ;;  %p571_p5 = scmp.lt.s32.totalorder %s569_s28, %s563_s26 }
  0x3d   : > { %p566_p1 = pneg %p565_p13 }
  0x3e   : > { %p572_p8 = por %p571_p5, %p570_p3 }
  0x40   : > { %p573_p10 = pnand %p572_p8, %p566_p1 }
  0xc0   : > { %v191_v5 = vpop.xlane.xlu0 %190 }
  0xc1   : > { %472 = vmatpush3.msra.mxu0 %v191_v5 }
  0xc2   : > { %474 = vmatmul.mubr.msk.f32.vlgmr.msra.gmra.mxu0 %vm193_vm1, %v192_v4 }
 0x182   : > { %v263_v6 = vpop.f32.mrf.mxu0 }
 0x183   : > { %v267_v7 = vmax.f32 %v263_v6, 0.0 }
 0x184   : > { %v475_v9 = vpop.f32.mrf.mxu0 }
 0x185   : > { %477 = vmatpush3.msk.msra.mxu1 %vm273_vm2, %v267_v7 }
 0x186   : > { %479 = vmatmul.mubr.msk.f32.vlgmr.msra.gmra.mxu1 %vm269_vm3, %v268_v8 }
 0x246   : > { %v343_v11 = vpop.f32.mrf.mxu1 }
 0x247   : > { %v459_v12 = vmul.f32 -1.442695, %v343_v11 }
 0x248   : > { %v480_v13 = vpop.f32.mrf.mxu1 }
 0x249   : > { %531 = vpow2.f32 %v459_v12 }
 0x256   : > { %v532_v14 = vpop.eup %531 }
 0x257   : > { %v350_v15 = vadd.f32 1.0, %v532_v14 }
 0x259   : > { %533 = vrcp.f32 %v350_v15 }
 0x266   : > { %v534_v16 = vpop.eup %533 }
 0x267   : > { %355 = vperm.xlu0 %530, %v534_v16  }
 0x2e2   : > { %v356_v17 = vpop.permute.xlu0 %355 }
 0x2e3   : > { %v358_v18 = vmul.f32 %v356_v17, %v187_v1  ;;  %v359_v19 = vmul.f32 %v356_v17, %v188_v2 }
 0x2e5   : > { %360 = vst [vmem:[%s186_s10] sm:$0xff] %v358_v18  ;;  %361 = vst [vmem:[%s186_s10 + $0x8] sm:$0xff] %v359_v19 }
 0x2e6   : > { %576 = shalt.err (!%p573_p10)
}
 0x2e7   : > { %s577_s30 = scalar_lea.hbm %s774_s20, 256  ;;  %s581_s7 = scalar_lea.hbm %s814_s3, 512 }
 0x2e8   : > { %p578_p2 = scmp.ne.s32.totalorder %s774_s20, %s577_s30  ;;  %p582_p7 = scmp.lt.s32.totalorder %s774_s20, %s814_s3 }
 0x2e9   : > { %p583_p0 = scmp.lt.s32.totalorder %s581_s7, %s577_s30 }
 0x2ea   : > { %p579_p4 = pnand %p578_p2, %p825_p12 }
 0x2eb   : > { %p584_p6 = por %p583_p0, %p582_p7 }
 0x2ec   : > { %p580_p9 = pneg %p579_p4 }
 0x2ee   : > { %p585_p11 = pnand %p584_p6, %p580_p9 }
 0x2f0   : > { %588 = shalt.err (!%p585_p11)
}
 0x2f1   : > { %483 = dma.vmem_to_hbm [thread:$0]  (%p825_p12), %s378_s11, 256, %s774_s20, %s363_s22  }
 0x2f2 PF: > { %s389_s23 = sand.u32 1, %s615_s12   ;;  %p826_p13 = scmp.ne.s32.totalorder %s820_s25, 0 }
 0x2f3   : > { %p827_p1 = scmp.ge.s32.totalorder %s627_s15, 2  ;;  %s390_s8 = scalar_lea.sflag [#allocation4], %s389_s23 }
 0x2f5   : > { %p490_p3 = pnand %p827_p1, %p826_p13 }
 0x2f7   : > { %p491_p5 = pneg %p490_p3 }
 0x2f9   : > { %610 = dma.done.wait (%p491_p5), %s390_s8, 256  }
 0x2fa   : > { %612 = vsyncadd (%p491_p5), %s390_s8, 4294967040  ;;  %p16_p8 = scmp.ge.s32.totalorder %s679_s18, 4   ;;  %s828_s12 = smov %s619_s13 }
 0x2fb   : > { %s829_s13 = smov %s623_s14  ;;  %s830_s14 = smov %s691_s21 }
 0x2fc   : > { %s831_s15 = smov %s679_s18  ;;  %18 = sbr.rel (!%p16_p8) target bundleno = 5 (0x5), region = 77 }
 0x301   :  { %395 = vsyncpa [#allocation3], 1 }
 0x302   :  { %397 = vsyncpa [#allocation3 + $0x1], 1 }
 0x303   :  { %398 = vsyncpa [#allocation4], 1 }
 0x304   :  { %400 = vsyncpa [#allocation4 + $0x1], 1 }

</bundles_post_ra>
